<compile_context>
chip_gen: v6e
topology: v6e:2x2x1
jax: 0.10.0
libtpu: 0.0.40
codegen_flags: <defaults>
</compile_context>

<pallas_src>
import functools
import math

import jax
import jax.numpy as jnp
from jax.experimental import pallas as pl
from jax.experimental.pallas import tpu as pltpu

D_MODEL = 32
N_HEADS = 4
D_K = D_MODEL // N_HEADS
D_FF = 64
EPS = 1e-6


def _layer_norm(x, gamma, beta):
    # tutorial LayerNorm: a * (x - mean) / (std_unbiased + eps) + b
    mean = jnp.mean(x, axis=-1, keepdims=True)
    var = jnp.sum((x - mean) ** 2, axis=-1, keepdims=True) * (1.0 / (x.shape[-1] - 1))
    inv = pl.reciprocal(jnp.sqrt(var) + EPS, approx=True)   # EUP slot — effectively free
    return gamma * (x - mean) * inv + beta


def encoder_layer_kernel(x_ref, mask_ref,
                         wqkv_ref, wo_ref, w1_ref, w2_ref,
                         bqkv_ref, b1_ref, vecs_ref,
                         o_ref, *, batch, seq):
    """One fused encoder layer. x_ref: [B*S, D]; mask_ref: [B, 1, S]."""
    B, S = batch, seq
    x = x_ref[...]                                        # [B*S, D] f32

    # additive attention mask, computed once (hoisted out of the head loop)
    add_mask = jnp.where(mask_ref[...] == 0.0, -1e9, 0.0)  # [B, 1, S]

    w_qkv = wqkv_ref[...]                                 # [D, 3D]
    w_o = wo_ref[...]                                     # [D, D]
    w_1 = w1_ref[...]                                     # [D, D_FF]
    w_2 = w2_ref[...]                                     # [D_FF, D]
    b_qkv = bqkv_ref[...]                                 # [1, 3D]
    b_1 = b1_ref[...]                                     # [1, D_FF]
    vecs = vecs_ref[...]                                  # [6, D]: bo, b2, ln1_g, ln1_b, ln2_g, ln2_b
    b_o, b_2 = vecs[0:1], vecs[1:2]
    ln1_g, ln1_b = vecs[2:3], vecs[3:4]
    ln2_g, ln2_b = vecs[4:5], vecs[5:6]

    scale = 1.0 / math.sqrt(D_K)

    # ---- fused Q/K/V projection: one [B*S, D] x [D, 3D] matmul -------------
    qkv = jnp.dot(x, w_qkv, preferred_element_type=jnp.float32) + b_qkv
    q = (qkv[:, :D_MODEL] * scale).reshape(B, S, D_MODEL)        # scale hoisted onto q
    k = qkv[:, D_MODEL:2 * D_MODEL].reshape(B, S, D_MODEL)
    v = qkv[:, 2 * D_MODEL:].reshape(B, S, D_MODEL)

    # ---- multi-head self-attention, output projection fused per head -------
    # attn = concat_h(head_h) @ Wo + bo  ==  sum_h head_h @ Wo[h*Dk:(h+1)*Dk, :] + bo
    # (avoids the lane-concatenate relayout; Wo row slices are sublane-aligned)
    attn = jnp.zeros((B * S, D_MODEL), jnp.float32)
    for h in range(N_HEADS):                              # static head loop (4)
        sl = slice(h * D_K, (h + 1) * D_K)
        sc = jnp.einsum('bqd,bkd->bqk', q[..., sl], k[..., sl],
                        preferred_element_type=jnp.float32) + add_mask   # [B, S, S]
        sc = sc - jnp.max(sc, axis=-1, keepdims=True)                    # stable softmax
        p = jnp.exp(sc)
        p = p * pl.reciprocal(jnp.sum(p, axis=-1, keepdims=True), approx=True)
        head = jnp.einsum('bqk,bkd->bqd', p, v[..., sl],
                          preferred_element_type=jnp.float32)            # [B, S, D_K]
        attn = attn + jnp.dot(head.reshape(B * S, D_K), w_o[sl, :],
                              preferred_element_type=jnp.float32)
    attn = attn + b_o

    # ---- sublayer connection 1 (post-norm; dropout == identity in eval) ----
    # TODO(synk): dropout omitted (stochastic; identity in eval mode).
    x1 = _layer_norm(x + attn, ln1_g, ln1_b)

    # ---- position-wise feed-forward -----------------------------------------
    h1 = jnp.maximum(jnp.dot(x1, w_1, preferred_element_type=jnp.float32) + b_1, 0.0)
    ff = jnp.dot(h1, w_2, preferred_element_type=jnp.float32) + b_2

    # ---- sublayer connection 2 ----------------------------------------------
    o_ref[...] = _layer_norm(x1 + ff, ln2_g, ln2_b).astype(o_ref.dtype)


def encoder_forward(x, src_mask, p):
    """Apply one EncoderLayer (single fused pallas_call, single grid step)."""
    B, S, D = x.shape
    x2d = x.reshape(B * S, D)                             # free HBM reshape in the wrapper

    # pack parameters: fused QKV weight/bias + one [6, D] slab for small vectors
    w_qkv = jnp.concatenate([p["wq"], p["wk"], p["wv"]], axis=1)   # [D, 3D]
    b_qkv = jnp.concatenate([p["bq"], p["bk"], p["bv"]], axis=1)   # [1, 3D]
    vecs = jnp.concatenate([p["bo"], p["b2"], p["ln1_g"], p["ln1_b"],
                            p["ln2_g"], p["ln2_b"]], axis=0)       # [6, D]

    def full(shape):
        return pl.BlockSpec(shape, lambda i, _s=shape: (0,) * len(_s))

    out2d = pl.pallas_call(
        functools.partial(encoder_layer_kernel, batch=B, seq=S),
        out_shape=jax.ShapeDtypeStruct((B * S, D), x.dtype),
        grid_spec=pltpu.PrefetchScalarGridSpec(
            num_scalar_prefetch=0,
            grid=(1,),                                    # single grid step: whole problem in VMEM
            in_specs=[
                full((B * S, D)),       # x
                full((B, 1, S)),        # src_mask
                full((D, 3 * D)),       # fused Wq|Wk|Wv
                full((D, D)),           # Wo
                full((D, D_FF)),        # W1
                full((D_FF, D)),        # W2
                full((1, 3 * D)),       # fused bq|bk|bv
                full((1, D_FF)),        # b1
                full((6, D)),           # packed bo, b2, ln1_g, ln1_b, ln2_g, ln2_b
            ],
            out_specs=full((B * S, D)),
        ),
        compiler_params=pltpu.CompilerParams(dimension_semantics=("arbitrary",)),
    )(x2d, src_mask, w_qkv, p["wo"], p["w1"], p["w2"], b_qkv, p["b1"], vecs)
    return out2d.reshape(B, S, D)


# ------------------------- pure-JAX reference (for checking) -----------------
def ref_forward(x, mask, p):
    def ln(y, g, b):
        mean = jnp.mean(y, -1, keepdims=True)
        var = jnp.sum((y - mean) ** 2, -1, keepdims=True) / (y.shape[-1] - 1)
        return g * (y - mean) / (jnp.sqrt(var) + EPS) + b

    q = x @ p["wq"] + p["bq"]
    k = x @ p["wk"] + p["bk"]
    v = x @ p["wv"] + p["bv"]
    outs = []
    for h in range(N_HEADS):
        sl = slice(h * D_K, (h + 1) * D_K)
        s = jnp.einsum('bqd,bkd->bqk', q[..., sl], k[..., sl]) / math.sqrt(D_K)
        s = jnp.where(mask == 0.0, -1e9, s)
        a = jax.nn.softmax(s, axis=-1)
        outs.append(jnp.einsum('bqk,bkd->bqd', a, v[..., sl]))
    attn = jnp.concatenate(outs, -1) @ p["wo"] + p["bo"]
    x1 = ln(x + attn, p["ln1_g"], p["ln1_b"])
    h1 = jnp.maximum(x1 @ p["w1"] + p["b1"], 0.0)
    ff = h1 @ p["w2"] + p["b2"]
    return ln(x1 + ff, p["ln2_g"], p["ln2_b"])


def init_params(key):
    ks = jax.random.split(key, 6)
    w = lambda k, shape: (0.1 * jax.random.normal(k, shape)).astype(jnp.float32)
    zeros = lambda n: jnp.zeros((1, n), jnp.float32)
    ones = lambda n: jnp.ones((1, n), jnp.float32)
    return dict(
        wq=w(ks[0], (D_MODEL, D_MODEL)), bq=zeros(D_MODEL),
        wk=w(ks[1], (D_MODEL, D_MODEL)), bk=zeros(D_MODEL),
        wv=w(ks[2], (D_MODEL, D_MODEL)), bv=zeros(D_MODEL),
        wo=w(ks[3], (D_MODEL, D_MODEL)), bo=zeros(D_MODEL),
        w1=w(ks[4], (D_MODEL, D_FF)),    b1=zeros(D_FF),
        w2=w(ks[5], (D_FF, D_MODEL)),    b2=zeros(D_MODEL),
        ln1_g=ones(D_MODEL), ln1_b=zeros(D_MODEL),
        ln2_g=ones(D_MODEL), ln2_b=zeros(D_MODEL),
    )


if __name__ == "__main__":
    B, S = 2, 8
    key = jax.random.PRNGKey(0)
    kx, kp = jax.random.split(key)
    x = jax.random.normal(kx, (B, S, D_MODEL), dtype=jnp.float32)
    # mask: batch 0 attends everywhere; batch 1 masks the last two key positions
    src_mask = jnp.ones((B, 1, S), dtype=jnp.float32)
    src_mask = src_mask.at[1, 0, S - 2:].set(0.0)

    params = init_params(kp)

    out = encoder_forward(x, src_mask, params)
    out = jax.block_until_ready(out)

    ref = jax.block_until_ready(ref_forward(x, src_mask, params))
    assert out.shape == (B, S, D_MODEL)
    assert jnp.allclose(out, ref, atol=3e-2, rtol=3e-2), "mismatch vs JAX reference"

    print("KERNEL_OK")
</pallas_src>

<mosaic_0001>
module attributes {stable_mosaic.version = 11 : i64} {
  func.func @encoder_layer_kernel(%arg0: i32, %arg1: memref<16x32xf32, #tpu.memory_space<vmem>>, %arg2: memref<2x1x8xf32, #tpu.memory_space<vmem>>, %arg3: memref<32x96xf32, #tpu.memory_space<vmem>>, %arg4: memref<32x32xf32, #tpu.memory_space<vmem>>, %arg5: memref<32x64xf32, #tpu.memory_space<vmem>>, %arg6: memref<64x32xf32, #tpu.memory_space<vmem>>, %arg7: memref<1x96xf32, #tpu.memory_space<vmem>>, %arg8: memref<1x64xf32, #tpu.memory_space<vmem>>, %arg9: memref<6x32xf32, #tpu.memory_space<vmem>>, %arg10: memref<16x32xf32, #tpu.memory_space<vmem>>) attributes {dimension_semantics = [#tpu.dimension_semantics<arbitrary>], iteration_bounds = array<i64: 1>, scalar_prefetch = 0 : i64, scratch_operands = 0 : i64, tpu.core_type = #tpu.core_type<tc>, window_params = [{pipeline_mode = #tpu.pipeline_mode<synchronous>, transform_indices = @transform_0, window_bounds = array<i64: 16, 32>}, {pipeline_mode = #tpu.pipeline_mode<synchronous>, transform_indices = @transform_1, window_bounds = array<i64: 2, 1, 8>}, {pipeline_mode = #tpu.pipeline_mode<synchronous>, transform_indices = @transform_2, window_bounds = array<i64: 32, 96>}, {pipeline_mode = #tpu.pipeline_mode<synchronous>, transform_indices = @transform_3, window_bounds = array<i64: 32, 32>}, {pipeline_mode = #tpu.pipeline_mode<synchronous>, transform_indices = @transform_4, window_bounds = array<i64: 32, 64>}, {pipeline_mode = #tpu.pipeline_mode<synchronous>, transform_indices = @transform_5, window_bounds = array<i64: 64, 32>}, {pipeline_mode = #tpu.pipeline_mode<synchronous>, transform_indices = @transform_6, window_bounds = array<i64: 1, 96>}, {pipeline_mode = #tpu.pipeline_mode<synchronous>, transform_indices = @transform_7, window_bounds = array<i64: 1, 64>}, {pipeline_mode = #tpu.pipeline_mode<synchronous>, transform_indices = @transform_8, window_bounds = array<i64: 6, 32>}, {pipeline_mode = #tpu.pipeline_mode<synchronous>, transform_indices = @transform_9, window_bounds = array<i64: 16, 32>}]} {
    %c0 = arith.constant 0 : index
    %c0_0 = arith.constant 0 : index
    %0 = vector.load %arg1[%c0, %c0_0] : memref<16x32xf32, #tpu.memory_space<vmem>>, vector<16x32xf32>
    %c0_1 = arith.constant 0 : index
    %c0_2 = arith.constant 0 : index
    %c0_3 = arith.constant 0 : index
    %1 = vector.load %arg2[%c0_1, %c0_2, %c0_3] : memref<2x1x8xf32, #tpu.memory_space<vmem>>, vector<2x1x8xf32>
    %cst = arith.constant 0.000000e+00 : f32
    %2 = vector.broadcast %cst : f32 to vector<2x1x8xf32>
    %3 = arith.cmpf oeq, %1, %2 : vector<2x1x8xf32>
    %cst_4 = arith.constant -1.000000e+09 : f32
    %cst_5 = arith.constant 0.000000e+00 : f32
    %4 = vector.broadcast %cst_4 : f32 to vector<2x1x8xf32>
    %5 = vector.broadcast %cst_5 : f32 to vector<2x1x8xf32>
    %6 = arith.select %3, %4, %5 : vector<2x1x8xi1>, vector<2x1x8xf32>
    %c0_6 = arith.constant 0 : index
    %c0_7 = arith.constant 0 : index
    %7 = vector.load %arg3[%c0_6, %c0_7] : memref<32x96xf32, #tpu.memory_space<vmem>>, vector<32x96xf32>
    %c0_8 = arith.constant 0 : index
    %c0_9 = arith.constant 0 : index
    %8 = vector.load %arg4[%c0_8, %c0_9] : memref<32x32xf32, #tpu.memory_space<vmem>>, vector<32x32xf32>
    %c0_10 = arith.constant 0 : index
    %c0_11 = arith.constant 0 : index
    %9 = vector.load %arg5[%c0_10, %c0_11] : memref<32x64xf32, #tpu.memory_space<vmem>>, vector<32x64xf32>
    %c0_12 = arith.constant 0 : index
    %c0_13 = arith.constant 0 : index
    %10 = vector.load %arg6[%c0_12, %c0_13] : memref<64x32xf32, #tpu.memory_space<vmem>>, vector<64x32xf32>
    %c0_14 = arith.constant 0 : index
    %c0_15 = arith.constant 0 : index
    %11 = vector.load %arg7[%c0_14, %c0_15] : memref<1x96xf32, #tpu.memory_space<vmem>>, vector<1x96xf32>
    %c0_16 = arith.constant 0 : index
    %c0_17 = arith.constant 0 : index
    %12 = vector.load %arg8[%c0_16, %c0_17] : memref<1x64xf32, #tpu.memory_space<vmem>>, vector<1x64xf32>
    %c0_18 = arith.constant 0 : index
    %c0_19 = arith.constant 0 : index
    %13 = vector.load %arg9[%c0_18, %c0_19] : memref<6x32xf32, #tpu.memory_space<vmem>>, vector<6x32xf32>
    %14 = vector.extract_strided_slice %13 {offsets = [0, 0], sizes = [1, 32], strides = [1, 1]} : vector<6x32xf32> to vector<1x32xf32>
    %15 = vector.extract_strided_slice %13 {offsets = [1, 0], sizes = [1, 32], strides = [1, 1]} : vector<6x32xf32> to vector<1x32xf32>
    %16 = vector.extract_strided_slice %13 {offsets = [2, 0], sizes = [1, 32], strides = [1, 1]} : vector<6x32xf32> to vector<1x32xf32>
    %17 = vector.extract_strided_slice %13 {offsets = [3, 0], sizes = [1, 32], strides = [1, 1]} : vector<6x32xf32> to vector<1x32xf32>
    %18 = vector.extract_strided_slice %13 {offsets = [4, 0], sizes = [1, 32], strides = [1, 1]} : vector<6x32xf32> to vector<1x32xf32>
    %19 = vector.extract_strided_slice %13 {offsets = [5, 0], sizes = [1, 32], strides = [1, 1]} : vector<6x32xf32> to vector<1x32xf32>
    %cst_20 = arith.constant dense<0.000000e+00> : vector<16x96xf32>
    %20 = tpu.matmul %0, %7, %cst_20 {dimension_numbers = #tpu.dot_dimension_numbers<[1], [0], [0], [1], [0, 0, 1, 1], [], []>} : vector<16x32xf32>, vector<32x96xf32>, vector<16x96xf32> -> vector<16x96xf32>
    %21 = vector.broadcast %11 : vector<1x96xf32> to vector<16x96xf32>
    %22 = arith.addf %20, %21 : vector<16x96xf32>
    %23 = vector.extract_strided_slice %22 {offsets = [0, 0], sizes = [16, 32], strides = [1, 1]} : vector<16x96xf32> to vector<16x32xf32>
    %cst_21 = arith.constant 0.353553385 : f32
    %24 = vector.broadcast %cst_21 : f32 to vector<16x32xf32>
    %25 = arith.mulf %23, %24 : vector<16x32xf32>
    %26 = vector.shape_cast %25 : vector<16x32xf32> to vector<2x8x32xf32>
    %27 = vector.extract_strided_slice %22 {offsets = [0, 32], sizes = [16, 32], strides = [1, 1]} : vector<16x96xf32> to vector<16x32xf32>
    %28 = vector.shape_cast %27 : vector<16x32xf32> to vector<2x8x32xf32>
    %29 = vector.extract_strided_slice %22 {offsets = [0, 64], sizes = [16, 32], strides = [1, 1]} : vector<16x96xf32> to vector<16x32xf32>
    %30 = vector.shape_cast %29 : vector<16x32xf32> to vector<2x8x32xf32>
    %cst_22 = arith.constant 0.000000e+00 : f32
    %31 = vector.broadcast %cst_22 : f32 to vector<16x32xf32>
    %32 = vector.extract_strided_slice %26 {offsets = [0, 0, 0], sizes = [2, 8, 8], strides = [1, 1, 1]} : vector<2x8x32xf32> to vector<2x8x8xf32>
    %33 = vector.extract_strided_slice %28 {offsets = [0, 0, 0], sizes = [2, 8, 8], strides = [1, 1, 1]} : vector<2x8x32xf32> to vector<2x8x8xf32>
    "tpu.trace_start"() <{level = 10 : i32, message = "bqd,bkd->bqk"}> : () -> ()
    %cst_23 = arith.constant dense<0.000000e+00> : vector<2x8x8xf32>
    %34 = tpu.matmul %32, %33, %cst_23 {dimension_numbers = #tpu.dot_dimension_numbers<[2], [2], [1], [1], [0, 0, 0, 1, 1, 1], [0], [0]>} : vector<2x8x8xf32>, vector<2x8x8xf32>, vector<2x8x8xf32> -> vector<2x8x8xf32>
    "tpu.trace_stop"() : () -> ()
    %35 = vector.broadcast %6 : vector<2x1x8xf32> to vector<2x8x8xf32>
    %36 = arith.addf %34, %35 : vector<2x8x8xf32>
    %cst_24 = arith.constant dense<0xFF800000> : vector<2x8xf32>
    %37 = vector.multi_reduction <maximumf>, %36, %cst_24 [2] : vector<2x8x8xf32> to vector<2x8xf32>
    %38 = vector.shape_cast %37 : vector<2x8xf32> to vector<2x8x1xf32>
    %39 = vector.broadcast %38 : vector<2x8x1xf32> to vector<2x8x8xf32>
    %40 = arith.subf %36, %39 : vector<2x8x8xf32>
    %41 = math.exp %40 : vector<2x8x8xf32>
    %cst_25 = arith.constant dense<0.000000e+00> : vector<2x8xf32>
    %42 = vector.multi_reduction <add>, %41, %cst_25 [2] : vector<2x8x8xf32> to vector<2x8xf32>
    %43 = vector.shape_cast %42 : vector<2x8xf32> to vector<2x8x1xf32>
    %44 = tpu.reciprocal %43 {approx = true} : vector<2x8x1xf32> -> vector<2x8x1xf32>
    %45 = vector.broadcast %44 : vector<2x8x1xf32> to vector<2x8x8xf32>
    %46 = arith.mulf %41, %45 : vector<2x8x8xf32>
    %47 = vector.extract_strided_slice %30 {offsets = [0, 0, 0], sizes = [2, 8, 8], strides = [1, 1, 1]} : vector<2x8x32xf32> to vector<2x8x8xf32>
    "tpu.trace_start"() <{level = 10 : i32, message = "bqk,bkd->bqd"}> : () -> ()
    %cst_26 = arith.constant dense<0.000000e+00> : vector<2x8x8xf32>
    %48 = tpu.matmul %46, %47, %cst_26 {dimension_numbers = #tpu.dot_dimension_numbers<[2], [1], [1], [2], [0, 0, 0, 1, 1, 2], [0], [0]>} : vector<2x8x8xf32>, vector<2x8x8xf32>, vector<2x8x8xf32> -> vector<2x8x8xf32>
    "tpu.trace_stop"() : () -> ()
    %49 = vector.shape_cast %48 : vector<2x8x8xf32> to vector<16x8xf32>
    %50 = vector.extract_strided_slice %8 {offsets = [0, 0], sizes = [8, 32], strides = [1, 1]} : vector<32x32xf32> to vector<8x32xf32>
    %cst_27 = arith.constant dense<0.000000e+00> : vector<16x32xf32>
    %51 = tpu.matmul %49, %50, %cst_27 {dimension_numbers = #tpu.dot_dimension_numbers<[1], [0], [0], [1], [0, 0, 1, 1], [], []>} : vector<16x8xf32>, vector<8x32xf32>, vector<16x32xf32> -> vector<16x32xf32>
    %52 = arith.addf %31, %51 : vector<16x32xf32>
    %53 = vector.extract_strided_slice %26 {offsets = [0, 0, 8], sizes = [2, 8, 8], strides = [1, 1, 1]} : vector<2x8x32xf32> to vector<2x8x8xf32>
    %54 = vector.extract_strided_slice %28 {offsets = [0, 0, 8], sizes = [2, 8, 8], strides = [1, 1, 1]} : vector<2x8x32xf32> to vector<2x8x8xf32>
    "tpu.trace_start"() <{level = 10 : i32, message = "bqd,bkd->bqk"}> : () -> ()
    %cst_28 = arith.constant dense<0.000000e+00> : vector<2x8x8xf32>
    %55 = tpu.matmul %53, %54, %cst_28 {dimension_numbers = #tpu.dot_dimension_numbers<[2], [2], [1], [1], [0, 0, 0, 1, 1, 1], [0], [0]>} : vector<2x8x8xf32>, vector<2x8x8xf32>, vector<2x8x8xf32> -> vector<2x8x8xf32>
    "tpu.trace_stop"() : () -> ()
    %56 = vector.broadcast %6 : vector<2x1x8xf32> to vector<2x8x8xf32>
    %57 = arith.addf %55, %56 : vector<2x8x8xf32>
    %cst_29 = arith.constant dense<0xFF800000> : vector<2x8xf32>
    %58 = vector.multi_reduction <maximumf>, %57, %cst_29 [2] : vector<2x8x8xf32> to vector<2x8xf32>
    %59 = vector.shape_cast %58 : vector<2x8xf32> to vector<2x8x1xf32>
    %60 = vector.broadcast %59 : vector<2x8x1xf32> to vector<2x8x8xf32>
    %61 = arith.subf %57, %60 : vector<2x8x8xf32>
    %62 = math.exp %61 : vector<2x8x8xf32>
    %cst_30 = arith.constant dense<0.000000e+00> : vector<2x8xf32>
    %63 = vector.multi_reduction <add>, %62, %cst_30 [2] : vector<2x8x8xf32> to vector<2x8xf32>
    %64 = vector.shape_cast %63 : vector<2x8xf32> to vector<2x8x1xf32>
    %65 = tpu.reciprocal %64 {approx = true} : vector<2x8x1xf32> -> vector<2x8x1xf32>
    %66 = vector.broadcast %65 : vector<2x8x1xf32> to vector<2x8x8xf32>
    %67 = arith.mulf %62, %66 : vector<2x8x8xf32>
    %68 = vector.extract_strided_slice %30 {offsets = [0, 0, 8], sizes = [2, 8, 8], strides = [1, 1, 1]} : vector<2x8x32xf32> to vector<2x8x8xf32>
    "tpu.trace_start"() <{level = 10 : i32, message = "bqk,bkd->bqd"}> : () -> ()
    %cst_31 = arith.constant dense<0.000000e+00> : vector<2x8x8xf32>
    %69 = tpu.matmul %67, %68, %cst_31 {dimension_numbers = #tpu.dot_dimension_numbers<[2], [1], [1], [2], [0, 0, 0, 1, 1, 2], [0], [0]>} : vector<2x8x8xf32>, vector<2x8x8xf32>, vector<2x8x8xf32> -> vector<2x8x8xf32>
    "tpu.trace_stop"() : () -> ()
    %70 = vector.shape_cast %69 : vector<2x8x8xf32> to vector<16x8xf32>
    %71 = vector.extract_strided_slice %8 {offsets = [8, 0], sizes = [8, 32], strides = [1, 1]} : vector<32x32xf32> to vector<8x32xf32>
    %cst_32 = arith.constant dense<0.000000e+00> : vector<16x32xf32>
    %72 = tpu.matmul %70, %71, %cst_32 {dimension_numbers = #tpu.dot_dimension_numbers<[1], [0], [0], [1], [0, 0, 1, 1], [], []>} : vector<16x8xf32>, vector<8x32xf32>, vector<16x32xf32> -> vector<16x32xf32>
    %73 = arith.addf %52, %72 : vector<16x32xf32>
    %74 = vector.extract_strided_slice %26 {offsets = [0, 0, 16], sizes = [2, 8, 8], strides = [1, 1, 1]} : vector<2x8x32xf32> to vector<2x8x8xf32>
    %75 = vector.extract_strided_slice %28 {offsets = [0, 0, 16], sizes = [2, 8, 8], strides = [1, 1, 1]} : vector<2x8x32xf32> to vector<2x8x8xf32>
    "tpu.trace_start"() <{level = 10 : i32, message = "bqd,bkd->bqk"}> : () -> ()
    %cst_33 = arith.constant dense<0.000000e+00> : vector<2x8x8xf32>
    %76 = tpu.matmul %74, %75, %cst_33 {dimension_numbers = #tpu.dot_dimension_numbers<[2], [2], [1], [1], [0, 0, 0, 1, 1, 1], [0], [0]>} : vector<2x8x8xf32>, vector<2x8x8xf32>, vector<2x8x8xf32> -> vector<2x8x8xf32>
    "tpu.trace_stop"() : () -> ()
    %77 = vector.broadcast %6 : vector<2x1x8xf32> to vector<2x8x8xf32>
    %78 = arith.addf %76, %77 : vector<2x8x8xf32>
    %cst_34 = arith.constant dense<0xFF800000> : vector<2x8xf32>
    %79 = vector.multi_reduction <maximumf>, %78, %cst_34 [2] : vector<2x8x8xf32> to vector<2x8xf32>
    %80 = vector.shape_cast %79 : vector<2x8xf32> to vector<2x8x1xf32>
    %81 = vector.broadcast %80 : vector<2x8x1xf32> to vector<2x8x8xf32>
    %82 = arith.subf %78, %81 : vector<2x8x8xf32>
    %83 = math.exp %82 : vector<2x8x8xf32>
    %cst_35 = arith.constant dense<0.000000e+00> : vector<2x8xf32>
    %84 = vector.multi_reduction <add>, %83, %cst_35 [2] : vector<2x8x8xf32> to vector<2x8xf32>
    %85 = vector.shape_cast %84 : vector<2x8xf32> to vector<2x8x1xf32>
    %86 = tpu.reciprocal %85 {approx = true} : vector<2x8x1xf32> -> vector<2x8x1xf32>
    %87 = vector.broadcast %86 : vector<2x8x1xf32> to vector<2x8x8xf32>
    %88 = arith.mulf %83, %87 : vector<2x8x8xf32>
    %89 = vector.extract_strided_slice %30 {offsets = [0, 0, 16], sizes = [2, 8, 8], strides = [1, 1, 1]} : vector<2x8x32xf32> to vector<2x8x8xf32>
    "tpu.trace_start"() <{level = 10 : i32, message = "bqk,bkd->bqd"}> : () -> ()
    %cst_36 = arith.constant dense<0.000000e+00> : vector<2x8x8xf32>
    %90 = tpu.matmul %88, %89, %cst_36 {dimension_numbers = #tpu.dot_dimension_numbers<[2], [1], [1], [2], [0, 0, 0, 1, 1, 2], [0], [0]>} : vector<2x8x8xf32>, vector<2x8x8xf32>, vector<2x8x8xf32> -> vector<2x8x8xf32>
    "tpu.trace_stop"() : () -> ()
    %91 = vector.shape_cast %90 : vector<2x8x8xf32> to vector<16x8xf32>
    %92 = vector.extract_strided_slice %8 {offsets = [16, 0], sizes = [8, 32], strides = [1, 1]} : vector<32x32xf32> to vector<8x32xf32>
    %cst_37 = arith.constant dense<0.000000e+00> : vector<16x32xf32>
    %93 = tpu.matmul %91, %92, %cst_37 {dimension_numbers = #tpu.dot_dimension_numbers<[1], [0], [0], [1], [0, 0, 1, 1], [], []>} : vector<16x8xf32>, vector<8x32xf32>, vector<16x32xf32> -> vector<16x32xf32>
    %94 = arith.addf %73, %93 : vector<16x32xf32>
    %95 = vector.extract_strided_slice %26 {offsets = [0, 0, 24], sizes = [2, 8, 8], strides = [1, 1, 1]} : vector<2x8x32xf32> to vector<2x8x8xf32>
    %96 = vector.extract_strided_slice %28 {offsets = [0, 0, 24], sizes = [2, 8, 8], strides = [1, 1, 1]} : vector<2x8x32xf32> to vector<2x8x8xf32>
    "tpu.trace_start"() <{level = 10 : i32, message = "bqd,bkd->bqk"}> : () -> ()
    %cst_38 = arith.constant dense<0.000000e+00> : vector<2x8x8xf32>
    %97 = tpu.matmul %95, %96, %cst_38 {dimension_numbers = #tpu.dot_dimension_numbers<[2], [2], [1], [1], [0, 0, 0, 1, 1, 1], [0], [0]>} : vector<2x8x8xf32>, vector<2x8x8xf32>, vector<2x8x8xf32> -> vector<2x8x8xf32>
    "tpu.trace_stop"() : () -> ()
    %98 = vector.broadcast %6 : vector<2x1x8xf32> to vector<2x8x8xf32>
    %99 = arith.addf %97, %98 : vector<2x8x8xf32>
    %cst_39 = arith.constant dense<0xFF800000> : vector<2x8xf32>
    %100 = vector.multi_reduction <maximumf>, %99, %cst_39 [2] : vector<2x8x8xf32> to vector<2x8xf32>
    %101 = vector.shape_cast %100 : vector<2x8xf32> to vector<2x8x1xf32>
    %102 = vector.broadcast %101 : vector<2x8x1xf32> to vector<2x8x8xf32>
    %103 = arith.subf %99, %102 : vector<2x8x8xf32>
    %104 = math.exp %103 : vector<2x8x8xf32>
    %cst_40 = arith.constant dense<0.000000e+00> : vector<2x8xf32>
    %105 = vector.multi_reduction <add>, %104, %cst_40 [2] : vector<2x8x8xf32> to vector<2x8xf32>
    %106 = vector.shape_cast %105 : vector<2x8xf32> to vector<2x8x1xf32>
    %107 = tpu.reciprocal %106 {approx = true} : vector<2x8x1xf32> -> vector<2x8x1xf32>
    %108 = vector.broadcast %107 : vector<2x8x1xf32> to vector<2x8x8xf32>
    %109 = arith.mulf %104, %108 : vector<2x8x8xf32>
    %110 = vector.extract_strided_slice %30 {offsets = [0, 0, 24], sizes = [2, 8, 8], strides = [1, 1, 1]} : vector<2x8x32xf32> to vector<2x8x8xf32>
    "tpu.trace_start"() <{level = 10 : i32, message = "bqk,bkd->bqd"}> : () -> ()
    %cst_41 = arith.constant dense<0.000000e+00> : vector<2x8x8xf32>
    %111 = tpu.matmul %109, %110, %cst_41 {dimension_numbers = #tpu.dot_dimension_numbers<[2], [1], [1], [2], [0, 0, 0, 1, 1, 2], [0], [0]>} : vector<2x8x8xf32>, vector<2x8x8xf32>, vector<2x8x8xf32> -> vector<2x8x8xf32>
    "tpu.trace_stop"() : () -> ()
    %112 = vector.shape_cast %111 : vector<2x8x8xf32> to vector<16x8xf32>
    %113 = vector.extract_strided_slice %8 {offsets = [24, 0], sizes = [8, 32], strides = [1, 1]} : vector<32x32xf32> to vector<8x32xf32>
    %cst_42 = arith.constant dense<0.000000e+00> : vector<16x32xf32>
    %114 = tpu.matmul %112, %113, %cst_42 {dimension_numbers = #tpu.dot_dimension_numbers<[1], [0], [0], [1], [0, 0, 1, 1], [], []>} : vector<16x8xf32>, vector<8x32xf32>, vector<16x32xf32> -> vector<16x32xf32>
    %115 = arith.addf %94, %114 : vector<16x32xf32>
    %116 = vector.broadcast %14 : vector<1x32xf32> to vector<16x32xf32>
    %117 = arith.addf %115, %116 : vector<16x32xf32>
    %118 = arith.addf %0, %117 : vector<16x32xf32>
    %cst_43 = arith.constant dense<0.000000e+00> : vector<16xf32>
    %119 = vector.multi_reduction <add>, %118, %cst_43 [1] : vector<16x32xf32> to vector<16xf32>
    %120 = vector.shape_cast %119 : vector<16xf32> to vector<16x1xf32>
    %cst_44 = arith.constant 3.200000e+01 : f32
    %121 = vector.broadcast %cst_44 : f32 to vector<16x1xf32>
    %122 = arith.divf %120, %121 : vector<16x1xf32>
    %123 = vector.broadcast %122 : vector<16x1xf32> to vector<16x32xf32>
    %124 = arith.subf %118, %123 : vector<16x32xf32>
    %125 = arith.mulf %124, %124 : vector<16x32xf32>
    %cst_45 = arith.constant dense<0.000000e+00> : vector<16xf32>
    %126 = vector.multi_reduction <add>, %125, %cst_45 [1] : vector<16x32xf32> to vector<16xf32>
    %127 = vector.shape_cast %126 : vector<16xf32> to vector<16x1xf32>
    %cst_46 = arith.constant 0.0322580636 : f32
    %128 = vector.broadcast %cst_46 : f32 to vector<16x1xf32>
    %129 = arith.mulf %127, %128 : vector<16x1xf32>
    %130 = math.sqrt %129 : vector<16x1xf32>
    %cst_47 = arith.constant 9.99999997E-7 : f32
    %131 = vector.broadcast %cst_47 : f32 to vector<16x1xf32>
    %132 = arith.addf %130, %131 : vector<16x1xf32>
    %133 = tpu.reciprocal %132 {approx = true} : vector<16x1xf32> -> vector<16x1xf32>
    %134 = vector.broadcast %122 : vector<16x1xf32> to vector<16x32xf32>
    %135 = arith.subf %118, %134 : vector<16x32xf32>
    %136 = vector.broadcast %16 : vector<1x32xf32> to vector<16x32xf32>
    %137 = arith.mulf %136, %135 : vector<16x32xf32>
    %138 = vector.broadcast %133 : vector<16x1xf32> to vector<16x32xf32>
    %139 = arith.mulf %137, %138 : vector<16x32xf32>
    %140 = vector.broadcast %17 : vector<1x32xf32> to vector<16x32xf32>
    %141 = arith.addf %139, %140 : vector<16x32xf32>
    %cst_48 = arith.constant dense<0.000000e+00> : vector<16x64xf32>
    %142 = tpu.matmul %141, %9, %cst_48 {dimension_numbers = #tpu.dot_dimension_numbers<[1], [0], [0], [1], [0, 0, 1, 1], [], []>} : vector<16x32xf32>, vector<32x64xf32>, vector<16x64xf32> -> vector<16x64xf32>
    %143 = vector.broadcast %12 : vector<1x64xf32> to vector<16x64xf32>
    %144 = arith.addf %142, %143 : vector<16x64xf32>
    %cst_49 = arith.constant 0.000000e+00 : f32
    %145 = vector.broadcast %cst_49 : f32 to vector<16x64xf32>
    %146 = arith.maximumf %144, %145 : vector<16x64xf32>
    %cst_50 = arith.constant dense<0.000000e+00> : vector<16x32xf32>
    %147 = tpu.matmul %146, %10, %cst_50 {dimension_numbers = #tpu.dot_dimension_numbers<[1], [0], [0], [1], [0, 0, 1, 1], [], []>} : vector<16x64xf32>, vector<64x32xf32>, vector<16x32xf32> -> vector<16x32xf32>
    %148 = vector.broadcast %15 : vector<1x32xf32> to vector<16x32xf32>
    %149 = arith.addf %147, %148 : vector<16x32xf32>
    %150 = arith.addf %141, %149 : vector<16x32xf32>
    %cst_51 = arith.constant dense<0.000000e+00> : vector<16xf32>
    %151 = vector.multi_reduction <add>, %150, %cst_51 [1] : vector<16x32xf32> to vector<16xf32>
    %152 = vector.shape_cast %151 : vector<16xf32> to vector<16x1xf32>
    %cst_52 = arith.constant 3.200000e+01 : f32
    %153 = vector.broadcast %cst_52 : f32 to vector<16x1xf32>
    %154 = arith.divf %152, %153 : vector<16x1xf32>
    %155 = vector.broadcast %154 : vector<16x1xf32> to vector<16x32xf32>
    %156 = arith.subf %150, %155 : vector<16x32xf32>
    %157 = arith.mulf %156, %156 : vector<16x32xf32>
    %cst_53 = arith.constant dense<0.000000e+00> : vector<16xf32>
    %158 = vector.multi_reduction <add>, %157, %cst_53 [1] : vector<16x32xf32> to vector<16xf32>
    %159 = vector.shape_cast %158 : vector<16xf32> to vector<16x1xf32>
    %cst_54 = arith.constant 0.0322580636 : f32
    %160 = vector.broadcast %cst_54 : f32 to vector<16x1xf32>
    %161 = arith.mulf %159, %160 : vector<16x1xf32>
    %162 = math.sqrt %161 : vector<16x1xf32>
    %cst_55 = arith.constant 9.99999997E-7 : f32
    %163 = vector.broadcast %cst_55 : f32 to vector<16x1xf32>
    %164 = arith.addf %162, %163 : vector<16x1xf32>
    %165 = tpu.reciprocal %164 {approx = true} : vector<16x1xf32> -> vector<16x1xf32>
    %166 = vector.broadcast %154 : vector<16x1xf32> to vector<16x32xf32>
    %167 = arith.subf %150, %166 : vector<16x32xf32>
    %168 = vector.broadcast %18 : vector<1x32xf32> to vector<16x32xf32>
    %169 = arith.mulf %168, %167 : vector<16x32xf32>
    %170 = vector.broadcast %165 : vector<16x1xf32> to vector<16x32xf32>
    %171 = arith.mulf %169, %170 : vector<16x32xf32>
    %172 = vector.broadcast %19 : vector<1x32xf32> to vector<16x32xf32>
    %173 = arith.addf %171, %172 : vector<16x32xf32>
    %c0_56 = arith.constant 0 : index
    %c0_57 = arith.constant 0 : index
    %174 = vector.load %arg10[%c0_56, %c0_57] : memref<16x32xf32, #tpu.memory_space<vmem>>, vector<16x32xf32>
    tpu.vector_store %arg10[%c0_56, %c0_57], %173 {strides = array<i32>} : memref<16x32xf32, #tpu.memory_space<vmem>>, vector<16x32xf32>,
    return
  }
  func.func @transform_0(%arg0: i32) -> (i32, i32) {
    %c0_i32 = arith.constant 0 : i32
    %c0_i32_0 = arith.constant 0 : i32
    %c0_i32_1 = arith.constant 0 : i32
    return %c0_i32, %c0_i32_0 : i32, i32
  }
  func.func @transform_1(%arg0: i32) -> (i32, i32, i32) {
    %c0_i32 = arith.constant 0 : i32
    %c0_i32_0 = arith.constant 0 : i32
    %c0_i32_1 = arith.constant 0 : i32
    %c0_i32_2 = arith.constant 0 : i32
    return %c0_i32, %c0_i32_0, %c0_i32_1 : i32, i32, i32
  }
  func.func @transform_2(%arg0: i32) -> (i32, i32) {
    %c0_i32 = arith.constant 0 : i32
    %c0_i32_0 = arith.constant 0 : i32
    %c0_i32_1 = arith.constant 0 : i32
    return %c0_i32, %c0_i32_0 : i32, i32
  }
  func.func @transform_3(%arg0: i32) -> (i32, i32) {
    %c0_i32 = arith.constant 0 : i32
    %c0_i32_0 = arith.constant 0 : i32
    %c0_i32_1 = arith.constant 0 : i32
    return %c0_i32, %c0_i32_0 : i32, i32
  }
  func.func @transform_4(%arg0: i32) -> (i32, i32) {
    %c0_i32 = arith.constant 0 : i32
    %c0_i32_0 = arith.constant 0 : i32
    %c0_i32_1 = arith.constant 0 : i32
    return %c0_i32, %c0_i32_0 : i32, i32
  }
  func.func @transform_5(%arg0: i32) -> (i32, i32) {
    %c0_i32 = arith.constant 0 : i32
    %c0_i32_0 = arith.constant 0 : i32
    %c0_i32_1 = arith.constant 0 : i32
    return %c0_i32, %c0_i32_0 : i32, i32
  }
  func.func @transform_6(%arg0: i32) -> (i32, i32) {
    %c0_i32 = arith.constant 0 : i32
    %c0_i32_0 = arith.constant 0 : i32
    %c0_i32_1 = arith.constant 0 : i32
    return %c0_i32, %c0_i32_0 : i32, i32
  }
  func.func @transform_7(%arg0: i32) -> (i32, i32) {
    %c0_i32 = arith.constant 0 : i32
    %c0_i32_0 = arith.constant 0 : i32
    %c0_i32_1 = arith.constant 0 : i32
    return %c0_i32, %c0_i32_0 : i32, i32
  }
  func.func @transform_8(%arg0: i32) -> (i32, i32) {
    %c0_i32 = arith.constant 0 : i32
    %c0_i32_0 = arith.constant 0 : i32
    %c0_i32_1 = arith.constant 0 : i32
    return %c0_i32, %c0_i32_0 : i32, i32
  }
  func.func @transform_9(%arg0: i32) -> (i32, i32) {
    %c0_i32 = arith.constant 0 : i32
    %c0_i32_0 = arith.constant 0 : i32
    %c0_i32_1 = arith.constant 0 : i32
    return %c0_i32, %c0_i32_0 : i32, i32
  }
}

</mosaic_0001>

<bundles_post_ra>
// kernel: tpu_custom_call.1
= control target key start
LH: loop header
LB: loop body
LE: loop exit
PB: predicated region body
PF: predicated region fallthrough
CT: control target
= control target key end

     0   :  { %14 = vsyncpa [#allocation3], 0  ;;  %s2887_s0 = inlined_call_operand.hbm [shape: f32[16,32], index: 0, kind: input, shape index: {}]   ;;  %s2888_s1 = inlined_call_operand.hbm [shape: f32[2,1,8], index: 1, kind: input, shape index: {}]   ;;  %s2889_s2 = inlined_call_operand.vmem [shape: f32[32,96], index: 2, kind: input, shape index: {}]   ;;  %s2890_s3 = inlined_call_operand.vmem [shape: f32[32,32], index: 3, kind: input, shape index: {}]   ;;  %s2891_s4 = inlined_call_operand.vmem [shape: f32[32,64], index: 4, kind: input, shape index: {}]   ;;  %s2892_s5 = inlined_call_operand.vmem [shape: f32[64,32], index: 5, kind: input, shape index: {}]   ;;  %s2893_s6 = inlined_call_operand.vmem [shape: f32[1,96], index: 6, kind: input, shape index: {}]   ;;  %s2894_s7 = inlined_call_operand.vmem [shape: f32[1,64], index: 7, kind: input, shape index: {}]   ;;  %s2895_s8 = inlined_call_operand.vmem [shape: f32[6,32], index: 8, kind: input, shape index: {}]   ;;  %s2896_s9 = inlined_call_operand.hbm [shape: f32[16,32], index: 9, kind: output, shape index: {}]  }
   0x1   :  { %15 = vsyncpa [#allocation6], 0 }
   0x2   :  { %16 = vsyncpa [#allocation4], 0  ;;  %s2534_s30 = smov [#allocation2]  }
   0x3   :  { %s22_s10 = sshll.u32 %s2534_s30, 4  ;;  %s23_s10 = int_to_ptr.vmem [resolvable:$true] %s22_s10 }
   0x4   :  { %s2476_s11 = scalar_lea.vmem %s23_s10, 256  ;;  %p2481_p1 = scmp.lt.s32.totalorder %s23_s10, %s23_s10 }
   0x5   :  { %p2477_p0 = scmp.ne.s32.totalorder %s23_s10, %s2476_s11  ;;  %p2482_p2 = scmp.lt.s32.totalorder %s2476_s11, %s2476_s11 }
   0x7   :  { %p2483_p3 = por %p2482_p2, %p2481_p1 }
   0x9   :  { %p2484_p4 = pnand %p2483_p3, %p2477_p0 }
   0xb   :  { %2487 = shalt.err (!%p2484_p4)
}
   0xc   :  { %s2535_s12 = smov 128   ;;  %s2536_s13 = smov 8  }
   0xd   :  { %28 = dma.hbm_to_vmem [thread:$0]  %s2887_s0, 256, %s23_s10, [#allocation3], %s2535_s12, %s2535_s12, %s2536_s13  }
   0xe   :  { %s2537_s16 = smov [#allocation5]  }
   0xf   :  { %s34_s17 = sshll.u32 %s2537_s16, 4  ;;  %s35_s17 = int_to_ptr.vmem [resolvable:$true] %s34_s17 }
  0x10   :  { %s2496_s18 = scalar_lea.vmem %s35_s17, 32  ;;  %p2501_p6 = scmp.lt.s32.totalorder %s35_s17, %s35_s17 }
  0x11   :  { %p2497_p5 = scmp.ne.s32.totalorder %s35_s17, %s2496_s18  ;;  %p2502_p7 = scmp.lt.s32.totalorder %s2496_s18, %s2496_s18 }
  0x13   :  { %p2503_p8 = por %p2502_p7, %p2501_p6 }
  0x15   :  { %p2504_p9 = pnand %p2503_p8, %p2497_p5 }
  0x17   :  { %2507 = shalt.err (!%p2504_p9)
}
  0x18   :  { %s2538_s19 = smov 16   ;;  %s2539_s20 = smov 1  }
  0x19   :  { %40 = dma.hbm_to_vmem [thread:$0]  %s2888_s1, 32, %s35_s17, [#allocation6], %s2538_s19, %s2538_s19, %s2539_s20  }
  0x1a   :  { %2528 = dma.done.wait [#allocation3], 256  }
  0x1b   :  { %2529 = vsyncadd [#allocation3], 4294967040 }
  0x1c   :  { %2530 = dma.done.wait [#allocation6], 32  }
  0x1d   :  { %2531 = vsyncadd [#allocation6], 4294967264  ;;  %vm98_vm0 = vcmask 261120   ;;  %v72_v0 = vld [vmem:[%s2889_s2 + $0x18] sm:$0xff]  ;;  %v71_v1 = vld [vmem:[%s2889_s2 + $0x10] sm:$0xff]  ;;  %v2540_v6 = vmov 0.0   ;;  %v184_v16 = vlaneseq }
  0x1e   :  { %2259 = vmatprep.subr.mxu0 %v72_v0  ;;  %v2619_v2 = vld [vmem:[#allocation2] sm:$0xff]  ;;  %v70_v3 = vld [vmem:[%s2889_s2 + $0x8] sm:$0xff]  ;;  %2275 = vmatprep.subr.mxu1 %v2540_v6  ;;  %vm2541_vm1 = vmmov 0   ;;  %s2542_s30 = smov 96   ;;  %vm197_vm2 = vcmask 64512   ;;  %s2544_s10 = smov 120  }
  0x1f   :  { %2260 = vmatpush3.msra.mxu0 %v72_v0  ;;  %2267 = vmatprep.mubr.msk.f32.mxu0 %vm98_vm0, %v2619_v2  ;;  %v69_v4 = vld [vmem:[%s2889_s2] sm:$0xff]  ;;  %v2629_v5 = vld [vmem:[#allocation2 + $0x8] sm:$0xff]  ;;  %v63_v17 = vld [vmem:[#allocation5] sm:$0x1]  ;;  %v2666_v18 = vshrl.u32 %v184_v16, 7  ;;  %s2545_s11 = smov 88  }
  0x20   :  { %2261 = vmatprep.subr.mxu0 %v71_v1  ;;  %2277 = vmatprep.mubr.msk.f32.mxu1 %vm2541_vm1, %v2540_v6  ;;  %v2153_v8 = vld [vmem:[%s2893_s6] ss:$0 sm:$0xff]  ;;  %vm65_vm3 = vcmp.eq.f32.partialorder %v63_v17, 0.0  ;;  %v64_v19 = vld [vmem:[#allocation5 + $0x1] sm:$0x1]  ;;  %s2543_s6 = smov 64  }
  0x21   :  { %2262 = vmatpush3.msra.mxu0 %v71_v1  ;;  %v2669_v20 = vsub.s32 0, %v2666_v18  ;;  %v67_v21 = vsel %vm65_vm3, -1e+09, %v2540_v6  ;;  %vm66_vm4 = vcmp.eq.f32.partialorder %v64_v19, 0.0  ;;  %s2546_s14 = smov 56   ;;  %s2547_s15 = smov 112  }
  0x22   :  { %2263 = vmatprep.subr.mxu0 %v70_v3  ;;  %v68_v23 = vsel %vm66_vm4, -1e+09, %v2540_v6  ;;  %s2548_s16 = smov 80   ;;  %s2549_s21 = smov 48   ;;  %vm1997_vm9 = vcmask 523264  }
  0x23   :  { %2264 = vmatpush3.msra.mxu0 %v70_v3  ;;  %v2673_v22 = vrot.slane %v67_v21, %v2669_v20  ;;  %v2678_v26 = vrot.slane %v68_v23, %v2669_v20  ;;  %s2550_s22 = smov 72   ;;  %s2551_s0 = smov 104  }
  0x24   :  { %2265 = vmatprep.subr.mxu0 %v69_v4  ;;  %s2552_s25 = smov 40  }
  0x25   :  { %2266 = vmatpush3.msra.mxu0 %v69_v4 }
  0x26   :  { %2268 = vmatmul.mubr.msk.f32.vlgmr.msra.gmra.mxu0 %vm98_vm0, %v2629_v5  ;;  %2270 = vmatprep.subr.mxu0 %v2540_v6 }
  0x27   :  { %2272 = vmatprep.mubr.msk.f32.mxu0 %vm2541_vm1, %v2540_v6 }
  0xe6   :  { %v2269_v7 = vpop.f32.mrf.mxu0 }
  0xe7   :  { %v2645_v11 = vadd.f32 %v2269_v7, %v2153_v8 }
  0xe8   :  { %v171_v9 = vpop.f32.mrf.mxu0 }
  0xe9   :  { %v2642_v10 = vadd.f32 %v2153_v8, %v171_v9  ;;  %v2659_v15 = vmul.f32 0.35355338, %v2645_v11 }
  0xeb   :  { %195 = vrot.lane.b32.xlu0 %v2642_v10, %s2542_s30  ;;  %v2650_v13 = vmul.f32 0.35355338, %v2642_v10 }
  0xef   :  { %274 = vrot.lane.b32.xlu0 %v2645_v11, %s2542_s30 }
 0x15d   :  { %v196_v12 = vpop.permute.xlu0 %195 }
 0x15e   :  { %2271 = vmatpush3.xpose.msk.msra.mxu0 %vm197_vm2, %v196_v12 }
 0x15f   :  { %2280 = vmatprep.subr.mxu0 %v2540_v6 }
 0x161   :  { %v275_v14 = vpop.permute.xlu0 %274  ;;  %2273 = vmatmul.mubr.msk.f32.vlgmr.msra.gmra.mxu0 %vm197_vm2, %v2650_v13 }
 0x162   :  { %2276 = vmatpush3.xpose.msk.msra.mxu1 %vm197_vm2, %v275_v14  ;;  %2282 = vmatprep.mubr.msk.f32.mxu0 %vm2541_vm1, %v2540_v6 }
 0x163   :  { %2285 = vmatprep.subr.mxu1 %v2540_v6 }
 0x165   :  { %2278 = vmatmul.mubr.msk.f32.vlgmr.msra.gmra.mxu1 %vm197_vm2, %v2659_v15 }
 0x166   :  { %2287 = vmatprep.mubr.msk.f32.mxu1 %vm2541_vm1, %v2540_v6 }
 0x221   :  { %v269_v24 = vpop.f32.mrf.mxu0 }
 0x222   :  { %v270_v25 = vadd.f32 %v269_v24, %v2673_v22  ;;  %v73_v24 = vld [vmem:[%s2890_s3] sm:$0xff] }
 0x223   :  { %v2274_v27 = vpop.f32.mrf.mxu0 }
 0x224   :  { %v351_v28 = vsel %vm197_vm2, %v270_v25, -inf }
 0x225   :  { %v347_v29 = vpop.f32.mrf.mxu1  ;;  %352 = vmax.xlane.f32.xlu1 %v351_v28 }
 0x226   :  { %v348_v30 = vadd.f32 %v347_v29, %v2678_v26 }
 0x227   :  { %v2279_v31 = vpop.f32.mrf.mxu1 }
 0x228   :  { %v354_v32 = vsel %vm197_vm2, %v348_v30, -inf }
 0x229   :  { %355 = vmax.xlane.f32.xlu1 %v354_v32 }
 0x2ae   :  { %v353_v33 = vpop.xlane.xlu1 %352 }
 0x2af   :  { %v357_v34 = vsub.f32 %v270_v25, %v353_v33 }
 0x2b1   :  { %v359_v35 = vmul.f32 1.442695, %v357_v34 }
 0x2b2   :  { %v356_v36 = vpop.xlane.xlu1 %355 }
 0x2b3   :  { %2420 = vpow2.f32 %v359_v35  ;;  %v358_v37 = vsub.f32 %v348_v30, %v356_v36  ;;  %v74_v36 = vld [vmem:[%s2890_s3 + $0x8] sm:$0xff] }
 0x2b5   :  { %v361_v38 = vmul.f32 1.442695, %v358_v37 }
 0x2b7   :  { %2422 = vpow2.f32 %v361_v38 }
 0x2c0   :  { %v2421_v39 = vpop.eup %2420 }
 0x2c1   :  { %v363_v40 = vsel %vm197_vm2, %v2421_v39, 0.0 }
 0x2c2   :  { %364 = vadd.xlane.f32.xlu0 %v363_v40 }
 0x2c4   :  { %v2423_v41 = vpop.eup %2422 }
 0x2c5   :  { %v366_v42 = vsel %vm197_vm2, %v2423_v41, 0.0 }
 0x2c6   :  { %367 = vadd.xlane.f32.xlu1 %v366_v42 }
 0x2d7   :  { %373 = vrot.lane.b32.xlu1 %v2642_v10, %s2543_s6 }
 0x2d8   :  { %525 = vrot.lane.b32.xlu0 %v2650_v13, %s2544_s10 }
 0x2db   :  { %449 = vrot.lane.b32.xlu1 %v2645_v11, %s2543_s6 }
 0x2df   :  { %527 = vrot.lane.b32.xlu1 %v2642_v10, %s2545_s11 }
 0x2e3   :  { %605 = vrot.lane.b32.xlu1 %v2645_v11, %s2545_s11 }
 0x2e7   :  { %603 = vrot.lane.b32.xlu1 %v2659_v15, %s2544_s10 }
 0x34b   :  { %v365_v43 = vpop.xlane.xlu0 %364 }
 0x34c   :  { %2424 = vrcp.f32 %v365_v43 }
 0x34f   :  { %v368_v44 = vpop.xlane.xlu1 %367  ;;  %v526_v52 = vpop.permute.xlu0 %525 }
 0x350   :  { %2426 = vrcp.f32 %v368_v44 }
 0x353   :  { %v374_v45 = vpop.permute.xlu1 %373 }
 0x354   :  { %2281 = vmatpush3.msra.mxu0 %v374_v45 }
 0x355   :  { %2290 = vmatprep.subr.mxu0 %v2540_v6 }
 0x357   :  { %v450_v46 = vpop.permute.xlu1 %449 }
 0x358   :  { %2286 = vmatpush3.msra.mxu1 %v450_v46 }
 0x359   :  { %v2425_v47 = vpop.eup %2424  ;;  %2295 = vmatprep.subr.mxu1 %v2540_v6 }
 0x35a   :  { %v371_v48 = vmul.f32 %v2425_v47, %v2421_v39 }
 0x35b   :  { %v528_v49 = vpop.permute.xlu1 %527 }
 0x35c   :  { %2283 = vmatmul.mubr.msk.f32.vlgmr.msra.gmra.mxu0 %vm197_vm2, %v371_v48 }
 0x35d   :  { %v2427_v50 = vpop.eup %2426  ;;  %2291 = vmatpush3.xpose.msk.msra.mxu0 %vm197_vm2, %v528_v49  ;;  %2292 = vmatprep.mubr.msk.f32.mxu0 %vm2541_vm1, %v2540_v6 }
 0x35e   :  { %v372_v51 = vmul.f32 %v2427_v50, %v2423_v41  ;;  %2300 = vmatprep.subr.mxu0 %v2540_v6 }
 0x35f   :  { %v606_v53 = vpop.permute.xlu1 %605 }
 0x360   :  { %2288 = vmatmul.mubr.msk.f32.vlgmr.msra.gmra.mxu1 %vm197_vm2, %v372_v51  ;;  %2293 = vmatmul.mubr.msk.f32.vlgmr.msra.gmra.mxu0 %vm197_vm2, %v526_v52 }
 0x361   :  { %2296 = vmatpush3.xpose.msk.msra.mxu1 %vm197_vm2, %v606_v53  ;;  %2297 = vmatprep.mubr.msk.f32.mxu1 %vm2541_vm1, %v2540_v6 }
 0x362   :  { %2305 = vmatprep.subr.mxu1 %v2540_v6  ;;  %2302 = vmatprep.mubr.msk.f32.mxu0 %vm2541_vm1, %v2540_v6 }
 0x363   :  { %v604_v54 = vpop.permute.xlu1 %603 }
 0x364   :  { %2298 = vmatmul.mubr.msk.f32.vlgmr.msra.gmra.mxu1 %vm197_vm2, %v604_v54 }
 0x365   :  { %2307 = vmatprep.mubr.msk.f32.mxu1 %vm2541_vm1, %v2540_v6 }
 0x41c   :  { %v445_v55 = vpop.f32.mrf.mxu0 }
 0x41e   :  { %v2284_v56 = vpop.f32.mrf.mxu0 }
 0x420   :  { %v521_v57 = vpop.f32.mrf.mxu1  ;;  %v599_v58 = vpop.f32.mrf.mxu0 }
 0x421   :  { %v600_v59 = vadd.f32 %v599_v58, %v2673_v22 }
 0x422   :  { %v2289_v60 = vpop.f32.mrf.mxu1  ;;  %v2294_v61 = vpop.f32.mrf.mxu0 }
 0x423   :  { %v681_v62 = vsel %vm197_vm2, %v600_v59, -inf }
 0x424   :  { %v677_v63 = vpop.f32.mrf.mxu1  ;;  %682 = vmax.xlane.f32.xlu1 %v681_v62 }
 0x425   :  { %v678_v0 = vadd.f32 %v677_v63, %v2678_v26 }
 0x426   :  { %v2299_v1 = vpop.f32.mrf.mxu1 }
 0x427   :  { %v684_v3 = vsel %vm197_vm2, %v678_v0, -inf }
 0x428   :  { %685 = vmax.xlane.f32.xlu0 %v684_v3 }
 0x43e   :  { %779 = vrot.lane.b32.xlu0 %v2645_v11, %s2546_s14 }
 0x442   :  { %1017 = vrot.lane.b32.xlu0 %v2650_v13, %s2547_s15 }
 0x4ad   :  { %v683_v4 = vpop.xlane.xlu1 %682 }
 0x4ae   :  { %v687_v7 = vsub.f32 %v600_v59, %v683_v4 }
 0x4b0   :  { %v689_v12 = vmul.f32 1.442695, %v687_v7 }
 0x4b1   :  { %v686_v8 = vpop.xlane.xlu0 %685 }
 0x4b2   :  { %v688_v9 = vsub.f32 %v678_v0, %v686_v8 }
 0x4b4   :  { %v691_v14 = vmul.f32 1.442695, %v688_v9 }
 0x4b5   :  { %v780_v16 = vpop.permute.xlu0 %779 }
 0x4b6   :  { %2428 = vpow2.f32 %v691_v14  ;;  %2306 = vmatpush3.msra.mxu1 %v780_v16  ;;  %v75_v14 = vld [vmem:[%s2890_s3 + $0x10] sm:$0xff] }
 0x4b7   :  { %2430 = vpow2.f32 %v689_v12  ;;  %2315 = vmatprep.subr.mxu1 %v73_v24 }
 0x4b9   :  { %v1018_v44 = vpop.permute.xlu0 %1017 }
 0x4c3   :  { %v2429_v17 = vpop.eup %2428 }
 0x4c4   :  { %v696_v19 = vsel %vm197_vm2, %v2429_v17, 0.0  ;;  %v2431_v21 = vpop.eup %2430 }
 0x4c5   :  { %697 = vadd.xlane.f32.xlu1 %v696_v19  ;;  %v693_v23 = vsel %vm197_vm2, %v2431_v21, 0.0 }
 0x4c9   :  { %694 = vadd.xlane.f32.xlu1 %v693_v23 }
 0x4da   :  { %703 = vrot.lane.b32.xlu1 %v2642_v10, %s2546_s14 }
 0x4de   :  { %1019 = vrot.lane.b32.xlu1 %v2642_v10, %s2548_s16 }
 0x4e2   :  { %1097 = vrot.lane.b32.xlu1 %v2645_v11, %s2548_s16 }
 0x4e6   :  { %1095 = vrot.lane.b32.xlu1 %v2659_v15, %s2547_s15 }
 0x54e   :  { %v698_v25 = vpop.xlane.xlu1 %697 }
 0x54f   :  { %2432 = vrcp.f32 %v698_v25 }
 0x552   :  { %v695_v27 = vpop.xlane.xlu1 %694 }
 0x553   :  { %2434 = vrcp.f32 %v695_v27 }
 0x556   :  { %v704_v28 = vpop.permute.xlu1 %703 }
 0x557   :  { %2301 = vmatpush3.msra.mxu0 %v704_v28 }
 0x558   :  { %2310 = vmatprep.subr.mxu0 %v74_v36 }
 0x55a   :  { %v1020_v29 = vpop.permute.xlu1 %1019 }
 0x55c   :  { %v2433_v30 = vpop.eup %2432 }
 0x55d   :  { %v702_v31 = vmul.f32 %v2433_v30, %v2429_v17 }
 0x55e   :  { %v1098_v33 = vpop.permute.xlu1 %1097 }
 0x55f   :  { %2308 = vmatmul.mubr.msk.f32.vlgmr.msra.gmra.mxu1 %vm197_vm2, %v702_v31 }
 0x560   :  { %v2435_v32 = vpop.eup %2434  ;;  %2317 = vmatprep.mubr.msk.f32.mxu1 %vm197_vm2, %v445_v55  ;;  %2316 = vmatpush3.msra.mxu1 %v73_v24 }
 0x561   :  { %2325 = vmatprep.subr.mxu1 %v2540_v6  ;;  %v701_v34 = vmul.f32 %v2435_v32, %v2431_v21 }
 0x562   :  { %v1096_v35 = vpop.permute.xlu1 %1095 }
 0x563   :  { %2303 = vmatmul.mubr.msk.f32.vlgmr.msra.gmra.mxu0 %vm197_vm2, %v701_v34  ;;  %2318 = vmatmul.mubr.msk.f32.vlgmr.msra.gmra.mxu1 %vm197_vm2, %v521_v57 }
 0x564   :  { %2326 = vmatpush3.xpose.msk.msra.mxu1 %vm197_vm2, %v1098_v33  ;;  %2327 = vmatprep.mubr.msk.f32.mxu1 %vm2541_vm1, %v2540_v6 }
 0x565   :  { %2335 = vmatprep.subr.mxu1 %v2540_v6  ;;  %2311 = vmatpush3.msra.mxu0 %v74_v36 }
 0x566   :  { %2320 = vmatprep.subr.mxu0 %v2540_v6 }
 0x567   :  { %2328 = vmatmul.mubr.msk.f32.vlgmr.msra.gmra.mxu1 %vm197_vm2, %v1096_v35 }
 0x568   :  { %2337 = vmatprep.mubr.msk.f32.mxu1 %vm2541_vm1, %v2540_v6 }
 0x61f   :  { %v851_v37 = vpop.f32.mrf.mxu1 }
 0x621   :  { %v2309_v38 = vpop.f32.mrf.mxu1 }
 0x623   :  { %v775_v39 = vpop.f32.mrf.mxu0  ;;  %v2740_v40 = vpop.f32.mrf.mxu1 }
 0x624   :  { %2312 = vmatprep.mubr.msk.f32.mxu0 %vm197_vm2, %v775_v39 }
 0x625   :  { %v2304_v41 = vpop.f32.mrf.mxu0  ;;  %2313 = vmatmul.mubr.msk.f32.vlgmr.msra.gmra.mxu0 %vm197_vm2, %v851_v37  ;;  %v2744_v42 = vpop.f32.mrf.mxu1 }
 0x626   :  { %2321 = vmatpush3.xpose.msk.msra.mxu0 %vm197_vm2, %v1020_v29  ;;  %2322 = vmatprep.mubr.msk.f32.mxu0 %vm2541_vm1, %v2540_v6 }
 0x627   :  { %v1169_v43 = vpop.f32.mrf.mxu1  ;;  %2330 = vmatprep.subr.mxu0 %v2540_v6 }
 0x628   :  { %v1170_v45 = vadd.f32 %v1169_v43, %v2678_v26 }
 0x629   :  { %2323 = vmatmul.mubr.msk.f32.vlgmr.msra.gmra.mxu0 %vm197_vm2, %v1018_v44  ;;  %v2329_v46 = vpop.f32.mrf.mxu1 }
 0x62a   :  { %v1176_v47 = vsel %vm197_vm2, %v1170_v45, -inf  ;;  %2332 = vmatprep.mubr.msk.f32.mxu0 %vm2541_vm1, %v2540_v6 }
 0x62b   :  { %1177 = vmax.xlane.f32.xlu1 %v1176_v47 }
 0x63c   :  { %1195 = vrot.lane.b32.xlu1 %v2642_v10, %s2549_s21 }
 0x640   :  { %1432 = vrot.lane.b32.xlu1 %v2642_v10, %s2550_s22 }
 0x644   :  { %1510 = vrot.lane.b32.xlu1 %v2645_v11, %s2550_s22 }
 0x648   :  { %1508 = vrot.lane.b32.xlu1 %v2659_v15, %s2551_s0 }
 0x6b4   :  { %v1178_v48 = vpop.xlane.xlu1 %1177 }
 0x6b5   :  { %v1180_v50 = vsub.f32 %v1170_v45, %v1178_v48 }
 0x6b7   :  { %v1183_v51 = vmul.f32 1.442695, %v1180_v50 }
 0x6b8   :  { %v1196_v49 = vpop.permute.xlu1 %1195 }
 0x6b9   :  { %2331 = vmatpush3.msra.mxu0 %v1196_v49  ;;  %2436 = vpow2.f32 %v1183_v51 }
 0x6ba   :  { %2340 = vmatprep.subr.mxu0 %v75_v14 }
 0x6bc   :  { %v1433_v8 = vpop.permute.xlu1 %1432 }
 0x6c0   :  { %v1511_v25 = vpop.permute.xlu1 %1510 }
 0x6c4   :  { %v1509_v29 = vpop.permute.xlu1 %1508 }
 0x6c6   :  { %v2437_v58 = vpop.eup %2436 }
 0x6c7   :  { %v1188_v15 = vsel %vm197_vm2, %v2437_v58, 0.0 }
 0x6e5   :  { %v2759_v52 = vpop.f32.mrf.mxu0 }
 0x6e6   :  { %v1014_v34 = vadd.f32 %v2740_v40, %v2759_v52 }
 0x6e7   :  { %v2761_v53 = vpop.f32.mrf.mxu0 }
 0x6e8   :  { %v1009_v36 = vadd.f32 %v2744_v42, %v2761_v53 }
 0x6e9   :  { %v1091_v54 = vpop.f32.mrf.mxu0 }
 0x6ea   :  { %v1092_v55 = vadd.f32 %v1091_v54, %v2673_v22 }
 0x6eb   :  { %v2324_v56 = vpop.f32.mrf.mxu0 }
 0x6ec   :  { %v1173_v57 = vsel %vm197_vm2, %v1092_v55, -inf }
 0x6ed   :  { %1174 = vmax.xlane.f32.xlu0 %v1173_v57 }
 0x6f1   :  { %1189 = vadd.xlane.f32.xlu0 %v1188_v15 }
 0x776   :  { %v1175_v59 = vpop.xlane.xlu0 %1174 }
 0x777   :  { %v1179_v60 = vsub.f32 %v1092_v55, %v1175_v59 }
 0x779   :  { %v1181_v61 = vmul.f32 1.442695, %v1179_v60 }
 0x77a   :  { %v1190_v0 = vpop.xlane.xlu0 %1189 }
 0x77b   :  { %2438 = vpow2.f32 %v1181_v61 }
 0x77c   :  { %2440 = vrcp.f32 %v1190_v0 }
 0x788   :  { %v2439_v62 = vpop.eup %2438 }
 0x789   :  { %v1185_v63 = vsel %vm197_vm2, %v2439_v62, 0.0  ;;  %v2441_v3 = vpop.eup %2440 }
 0x78a   :  { %1186 = vadd.xlane.f32.xlu0 %v1185_v63  ;;  %v1194_v7 = vmul.f32 %v2441_v3, %v2437_v58  ;;  %v2814_v58 = vld [vmem:[%s2895_s8] sm:$0x3f] }
 0x78b   :  { %v1846_v15 = vrot.slane %v2814_v58, %v2669_v20 }
 0x7a0   :  { %1271 = vrot.lane.b32.xlu0 %v2645_v11, %s2549_s21 }
 0x7a4   :  { %1430 = vrot.lane.b32.xlu0 %v2650_v13, %s2551_s0 }
 0x813   :  { %v1187_v1 = vpop.xlane.xlu0 %1186 }
 0x814   :  { %2442 = vrcp.f32 %v1187_v1 }
 0x817   :  { %v1272_v4 = vpop.permute.xlu0 %1271 }
 0x818   :  { %2336 = vmatpush3.msra.mxu1 %v1272_v4 }
 0x819   :  { %2338 = vmatmul.mubr.msk.f32.vlgmr.msra.gmra.mxu1 %vm197_vm2, %v1194_v7  ;;  %2345 = vmatprep.subr.mxu1 %v2540_v6 }
 0x81a   :  { %2346 = vmatpush3.xpose.msk.msra.mxu1 %vm197_vm2, %v1433_v8  ;;  %2347 = vmatprep.mubr.msk.f32.mxu1 %vm2541_vm1, %v2540_v6 }
 0x81b   :  { %v1431_v9 = vpop.permute.xlu0 %1430  ;;  %2355 = vmatprep.subr.mxu1 %v2540_v6 }
 0x81d   :  { %2348 = vmatmul.mubr.msk.f32.vlgmr.msra.gmra.mxu1 %vm197_vm2, %v1431_v9 }
 0x81e   :  { %2357 = vmatprep.mubr.msk.f32.mxu1 %vm2541_vm1, %v2540_v6 }
 0x821   :  { %v2443_v13 = vpop.eup %2442 }
 0x822   :  { %v1193_v12 = vmul.f32 %v2443_v13, %v2439_v62 }
 0x824   :  { %2333 = vmatmul.mubr.msk.f32.vlgmr.msra.gmra.mxu0 %vm197_vm2, %v1193_v12 }
 0x825   :  { %2341 = vmatpush3.msra.mxu0 %v75_v14 }
 0x826   :  { %2350 = vmatprep.subr.mxu0 %v2540_v6 }
 0x8d9   :  { %v1343_v16 = vpop.f32.mrf.mxu1 }
 0x8db   :  { %v2339_v17 = vpop.f32.mrf.mxu1 }
 0x8dd   :  { %v1504_v19 = vpop.f32.mrf.mxu1 }
 0x8de   :  { %v1505_v21 = vadd.f32 %v1504_v19, %v2673_v22 }
 0x8df   :  { %v2349_v23 = vpop.f32.mrf.mxu1 }
 0x8e0   :  { %v1586_v24 = vsel %vm197_vm2, %v1505_v21, -inf  ;;  %v78_v23 = vld [vmem:[%s2891_s4 + $0x8] sm:$0xff] }
 0x8e1   :  { %1587 = vmax.xlane.f32.xlu0 %v1586_v24  ;;  %v77_v24 = vld [vmem:[%s2891_s4] sm:$0xff] }
 0x8e4   :  { %v1267_v27 = vpop.f32.mrf.mxu0 }
 0x8e5   :  { %2342 = vmatprep.mubr.msk.f32.mxu0 %vm197_vm2, %v1267_v27  ;;  %v87_v27 = vld [vmem:[%s2892_s5 + $0x30] sm:$0xff] }
 0x8e6   :  { %v2334_v28 = vpop.f32.mrf.mxu0  ;;  %2343 = vmatmul.mubr.msk.f32.vlgmr.msra.gmra.mxu0 %vm197_vm2, %v1343_v16 }
 0x8e7   :  { %2351 = vmatpush3.xpose.msk.msra.mxu0 %vm197_vm2, %v1511_v25  ;;  %2352 = vmatprep.mubr.msk.f32.mxu0 %vm2541_vm1, %v2540_v6  ;;  %v88_v25 = vld [vmem:[%s2892_s5 + $0x38] sm:$0xff]  ;;  %v86_v28 = vld [vmem:[%s2892_s5 + $0x28] sm:$0xff] }
 0x8e8   :  { %2360 = vmatprep.subr.mxu0 %v2540_v6 }
 0x8ea   :  { %2353 = vmatmul.mubr.msk.f32.vlgmr.msra.gmra.mxu0 %vm197_vm2, %v1509_v29  ;;  %v85_v29 = vld [vmem:[%s2892_s5 + $0x20] sm:$0xff] }
 0x8eb   :  { %2362 = vmatprep.mubr.msk.f32.mxu0 %vm2541_vm1, %v2540_v6 }
 0x96a   :  { %v1588_v22 = vpop.xlane.xlu0 %1587 }
 0x96b   :  { %v1592_v30 = vsub.f32 %v1505_v21, %v1588_v22  ;;  %v79_v21 = vld [vmem:[%s2891_s4 + $0x10] sm:$0xff] }
 0x96d   :  { %v1594_v31 = vmul.f32 1.442695, %v1592_v30 }
 0x96f   :  { %2444 = vpow2.f32 %v1594_v31 }
 0x97c   :  { %v2445_v32 = vpop.eup %2444 }
 0x97d   :  { %v1598_v33 = vsel %vm197_vm2, %v2445_v32, 0.0 }
 0x97e   :  { %1599 = vadd.xlane.f32.xlu0 %v1598_v33 }
 0x9a6   :  { %v2344_v35 = vpop.f32.mrf.mxu0 }
 0x9a7   :  { %v1429_v37 = vadd.f32 %v2344_v35, %v1014_v34 }
 0x9a8   :  { %v1419_v38 = vpop.f32.mrf.mxu0 }
 0x9a9   :  { %v1428_v39 = vadd.f32 %v1419_v38, %v1009_v36 }
 0x9aa   :  { %v1582_v41 = vpop.f32.mrf.mxu0 }
 0x9ab   :  { %v1583_v6 = vadd.f32 %v1582_v41, %v2678_v26 }
 0x9ac   :  { %v2354_v43 = vpop.f32.mrf.mxu0 }
 0x9ad   :  { %v1589_v44 = vsel %vm197_vm2, %v1583_v6, -inf }
 0x9ae   :  { %1590 = vmax.xlane.f32.xlu1 %v1589_v44 }
 0x9bf   :  { %1608 = vrot.lane.b32.xlu1 %v2642_v10, %s2552_s25  ;;  %v76_v10 = vld [vmem:[%s2890_s3 + $0x18] sm:$0xff] }
 0xa07   :  { %v1600_v45 = vpop.xlane.xlu0 %1599 }
 0xa08   :  { %2446 = vrcp.f32 %v1600_v45 }
 0xa15   :  { %v2447_v46 = vpop.eup %2446 }
 0xa16   :  { %v1606_v49 = vmul.f32 %v2447_v46, %v2445_v32 }
 0xa37   :  { %v1591_v40 = vpop.xlane.xlu1 %1590 }
 0xa38   :  { %v1593_v47 = vsub.f32 %v1583_v6, %v1591_v40  ;;  %v1892_v40 = vsub.s32 2, %v2666_v18 }
 0xa3a   :  { %v1596_v48 = vmul.f32 1.442695, %v1593_v47  ;;  %v1893_v46 = vrot.slane %v2814_v58, %v1892_v40  ;;  %v1900_v47 = vsub.s32 3, %v2666_v18 }
 0xa3b   :  { %v1609_v42 = vpop.permute.xlu1 %1608 }
 0xa3c   :  { %2448 = vpow2.f32 %v1596_v48  ;;  %2356 = vmatpush3.msra.mxu1 %v1609_v42 }
 0xa3d   :  { %2358 = vmatmul.mubr.msk.f32.vlgmr.msra.gmra.mxu1 %vm197_vm2, %v1606_v49  ;;  %2365 = vmatprep.subr.mxu1 %v76_v10 }
 0xa3e   :  { %2366 = vmatpush3.msra.mxu1 %v76_v10  ;;  %v1901_v10 = vrot.slane %v2814_v58, %v1900_v47 }
 0xa3f   :  { %2381 = vmatprep.subr.mxu1 %v88_v25 }
 0xa49   :  { %v2449_v26 = vpop.eup %2448 }
 0xa4a   :  { %v1601_v50 = vsel %vm197_vm2, %v2449_v26, 0.0 }
 0xa4b   :  { %1602 = vadd.xlane.f32.xlu0 %v1601_v50 }
 0xa61   :  { %1684 = vrot.lane.b32.xlu0 %v2645_v11, %s2552_s25 }
 0xad4   :  { %v1603_v51 = vpop.xlane.xlu0 %1602 }
 0xad5   :  { %2450 = vrcp.f32 %v1603_v51 }
 0xad8   :  { %v1685_v52 = vpop.permute.xlu0 %1684 }
 0xad9   :  { %2361 = vmatpush3.msra.mxu0 %v1685_v52 }
 0xae2   :  { %v2451_v53 = vpop.eup %2450 }
 0xae3   :  { %v1607_v54 = vmul.f32 %v2451_v53, %v2449_v26 }
 0xae5   :  { %2363 = vmatmul.mubr.msk.f32.vlgmr.msra.gmra.mxu0 %vm197_vm2, %v1607_v54  ;;  %v84_v54 = vld [vmem:[%s2892_s5 + $0x18] sm:$0xff] }
 0xafd   :  { %v1680_v55 = vpop.f32.mrf.mxu1 }
 0xafe   :  { %2367 = vmatprep.mubr.msk.f32.mxu1 %vm197_vm2, %v1680_v55  ;;  %v83_v55 = vld [vmem:[%s2892_s5 + $0x10] sm:$0xff] }
 0xaff   :  { %v2359_v56 = vpop.f32.mrf.mxu1 }
 0xb00   :  { %v82_v56 = vld [vmem:[%s2892_s5 + $0x8] sm:$0xff] }
 0xba5   :  { %v1756_v57 = vpop.f32.mrf.mxu0 }
 0xba6   :  { %2368 = vmatmul.mubr.msk.f32.vlgmr.msra.gmra.mxu1 %vm197_vm2, %v1756_v57  ;;  %v81_v57 = vld [vmem:[%s2892_s5] sm:$0xff]  ;;  %s2553_s5 = smov [#allocation7]  }
 0xba7   :  { %v2364_v11 = vpop.f32.mrf.mxu0  ;;  %2382 = vmatpush3.msra.mxu1 %v88_v25 }
 0xba8   :  { %2383 = vmatprep.subr.mxu1 %v87_v27  ;;  %v2188_v11 = vld [vmem:[%s2894_s7] ss:$0 sm:$0xff]  ;;  %s2140_s7 = sshll.u32 %s2553_s5, 4  ;;  %s2141_s7 = int_to_ptr.vmem [resolvable:$true] %s2140_s7 }
 0xba9   :  { %2384 = vmatpush3.msra.mxu1 %v87_v27  ;;  %s2508_s8 = scalar_lea.vmem %s2141_s7, 256  ;;  %p2513_p11 = scmp.lt.s32.totalorder %s2141_s7, %s2141_s7 }
 0xbaa   :  { %2385 = vmatprep.subr.mxu1 %v86_v28  ;;  %p2509_p10 = scmp.ne.s32.totalorder %s2141_s7, %s2508_s8  ;;  %p2514_p12 = scmp.lt.s32.totalorder %s2508_s8, %s2508_s8 }
 0xbab   :  { %2386 = vmatpush3.msra.mxu1 %v86_v28 }
 0xbac   :  { %2387 = vmatprep.subr.mxu1 %v85_v29  ;;  %p2515_p13 = por %p2514_p12, %p2513_p11 }
 0xbad   :  { %2388 = vmatpush3.msra.mxu1 %v85_v29 }
 0xbae   :  { %2389 = vmatprep.subr.mxu1 %v84_v54  ;;  %p2516_p0 = pnand %p2515_p13, %p2509_p10 }
 0xbaf   :  { %2390 = vmatpush3.msra.mxu1 %v84_v54 }
 0xbb0   :  { %2391 = vmatprep.subr.mxu1 %v83_v55 }
 0xbb1   :  { %2392 = vmatpush3.msra.mxu1 %v83_v55 }
 0xbb2   :  { %2393 = vmatprep.subr.mxu1 %v82_v56 }
 0xbb3   :  { %2394 = vmatpush3.msra.mxu1 %v82_v56 }
 0xbb4   :  { %2395 = vmatprep.subr.mxu1 %v81_v57 }
 0xbb5   :  { %2396 = vmatpush3.msra.mxu1 %v81_v57 }
 0xc66   :  { %v2369_v59 = vpop.f32.mrf.mxu1 }
 0xc67   :  { %v1842_v60 = vadd.f32 %v2369_v59, %v1429_v37 }
 0xc68   :  { %v1832_v61 = vpop.f32.mrf.mxu1 }
 0xc69   :  { %v1848_v62 = vadd.f32 %v1846_v15, %v1842_v60  ;;  %v1841_v63 = vadd.f32 %v1832_v61, %v1428_v39 }
 0xc6b   :  { %v1847_v0 = vadd.f32 %v1846_v15, %v1841_v63  ;;  %v1850_v1 = vadd.f32 %v1848_v62, %v2629_v5 }
 0xc6d   :  { %v1854_v3 = vsel %vm98_vm0, %v1850_v1, 0.0  ;;  %v1849_v4 = vadd.f32 %v1847_v0, %v2619_v2  ;;  %v80_v2 = vld [vmem:[%s2891_s4 + $0x18] sm:$0xff]  ;;  %v1995_v0 = vsub.s32 1, %v2666_v18 }
 0xc6e   :  { %1855 = vadd.xlane.f32.xlu0 %v1854_v3  ;;  %2370 = vmatprep.subr.mxu0 %v80_v2 }
 0xc6f   :  { %v1851_v7 = vsel %vm98_vm0, %v1849_v4, 0.0  ;;  %2371 = vmatpush3.msra.mxu0 %v80_v2 }
 0xc70   :  { %1852 = vadd.xlane.f32.xlu1 %v1851_v7  ;;  %2372 = vmatprep.subr.mxu0 %v79_v21 }
 0xc71   :  { %2373 = vmatpush3.msra.mxu0 %v79_v21 }
 0xc72   :  { %2374 = vmatprep.subr.mxu0 %v78_v23 }
 0xc73   :  { %2375 = vmatpush3.msra.mxu0 %v78_v23 }
 0xc74   :  { %2376 = vmatprep.subr.mxu0 %v77_v24 }
 0xc75   :  { %2377 = vmatpush3.msra.mxu0 %v77_v24 }
 0xcf7   :  { %v1856_v8 = vpop.xlane.xlu0 %1855 }
 0xcf8   :  { %v1859_v9 = vmul.f32 0.03125, %v1856_v8 }
 0xcf9   :  { %v1853_v13 = vpop.xlane.xlu1 %1852 }
 0xcfa   :  { %v1861_v20 = vsub.f32 %v1850_v1, %v1859_v9  ;;  %v1858_v12 = vmul.f32 0.03125, %v1853_v13  ;;  %v1996_v1 = vrot.slane %v2814_v58, %v1995_v0 }
 0xcfc   :  { %v1860_v14 = vsub.f32 %v1849_v4, %v1858_v12  ;;  %v1863_v16 = vmul.f32 %v1861_v20, %v1861_v20  ;;  %v1895_v42 = vmul.f32 %v1893_v46, %v1861_v20 }
 0xcfe   :  { %v1867_v17 = vsel %vm98_vm0, %v1863_v16, 0.0  ;;  %v1862_v19 = vmul.f32 %v1860_v14, %v1860_v14  ;;  %v1894_v49 = vmul.f32 %v1893_v46, %v1860_v14 }
 0xcff   :  { %1868 = vadd.xlane.f32.xlu0 %v1867_v17 }
 0xd00   :  { %v1864_v5 = vsel %vm98_vm0, %v1862_v19, 0.0 }
 0xd01   :  { %1865 = vadd.xlane.f32.xlu1 %v1864_v5 }
 0xd88   :  { %v1869_v22 = vpop.xlane.xlu0 %1868 }
 0xd89   :  { %v1871_v30 = vmul.f32 0.032258064, %v1869_v22 }
 0xd8a   :  { %v1866_v31 = vpop.xlane.xlu1 %1865 }
 0xd8b   :  { %2452 = vrsqrt.f32 %v1871_v30  ;;  %v1870_v32 = vmul.f32 0.032258064, %v1866_v31  ;;  %vm1881_vm5 = vcmp.eq.f32.partialorder %v1871_v30, inf  ;;  %v1884_v35 = vand.u32 2147483648, %v1871_v30 }
 0xd8c   :  { %vm1883_vm6 = vcmp.eq.f32.partialorder %v1871_v30, 0.0 }
 0xd8d   :  { %2454 = vrsqrt.f32 %v1870_v32  ;;  %vm1874_vm7 = vcmp.eq.f32.partialorder %v1870_v32, inf  ;;  %v1877_v6 = vand.u32 2147483648, %v1870_v32  ;;  %vm1876_vm8 = vcmp.eq.f32.partialorder %v1870_v32, 0.0 }
 0xd98   :  { %v2453_v33 = vpop.eup %2452 }
 0xd99   :  { %v1880_v34 = vmul.f32 %v2453_v33, %v1871_v30 }
 0xd9a   :  { %v2455_v36 = vpop.eup %2454 }
 0xd9b   :  { %v1882_v37 = vsel %vm1881_vm5, %v1871_v30, %v1880_v34  ;;  %v1873_v39 = vmul.f32 %v2455_v36, %v1870_v32 }
 0xd9c   :  { %v1885_v38 = vsel %vm1883_vm6, %v1884_v35, %v1882_v37 }
 0xd9d   :  { %v1887_v41 = vadd.f32 1e-06, %v1885_v38  ;;  %v1875_v43 = vsel %vm1874_vm7, %v1870_v32, %v1873_v39 }
 0xd9e   :  { %v1878_v44 = vsel %vm1876_vm8, %v1877_v6, %v1875_v43  ;;  %v2121_v43 = vsub.s32 4, %v2666_v18 }
 0xd9f   :  { %2456 = vrcp.f32 %v1887_v41  ;;  %v1886_v45 = vadd.f32 1e-06, %v1878_v44 }
 0xda0   :  { %v2122_v44 = vrot.slane %v2814_v58, %v2121_v43 }
 0xda1   :  { %2458 = vrcp.f32 %v1886_v45  ;;  %v2129_v45 = vsub.s32 5, %v2666_v18 }
 0xda3   :  { %v2130_v46 = vrot.slane %v2814_v58, %v2129_v45 }
 0xdac   :  { %v2457_v48 = vpop.eup %2456 }
 0xdad   :  { %v1897_v50 = vmul.f32 %v2457_v48, %v1895_v42 }
 0xdae   :  { %v2459_v26 = vpop.eup %2458 }
 0xdaf   :  { %v1896_v51 = vmul.f32 %v2459_v26, %v1894_v49  ;;  %v1903_v53 = vadd.f32 %v1901_v10, %v1897_v50 }
 0xdb1   :  { %v1902_v52 = vadd.f32 %v1901_v10, %v1896_v51 }
 0xdb3   :  { %2378 = vmatprep.mubr.msk.f32.mxu0 %vm98_vm0, %v1902_v52 }
 0xdb4   :  { %2379 = vmatmul.mubr.msk.f32.vlgmr.msra.gmra.mxu0 %vm98_vm0, %v1903_v53 }
 0xe74   :  { %v2380_v15 = vpop.f32.mrf.mxu0 }
 0xe75   :  { %v1988_v59 = vadd.f32 %v2380_v15, %v2188_v11 }
 0xe76   :  { %v1982_v60 = vpop.f32.mrf.mxu0 }
 0xe77   :  { %v1983_v61 = vadd.f32 %v2188_v11, %v1982_v60  ;;  %v1992_v63 = vmax.f32 %v1988_v59, 0.0 }
 0xe79   :  { %v1991_v62 = vmax.f32 %v1983_v61, 0.0 }
 0xe7b   :  { %2397 = vmatprep.mubr.msk.f32.mxu1 %vm1997_vm9, %v1991_v62 }
 0xe7c   :  { %2398 = vmatmul.mubr.msk.f32.vlgmr.msra.gmra.mxu1 %vm1997_vm9, %v1992_v63 }
 0xf3c   :  { %v2399_v3 = vpop.f32.mrf.mxu1 }
 0xf3d   :  { %v2076_v4 = vadd.f32 %v2399_v3, %v1996_v1 }
 0xf3e   :  { %v2070_v7 = vpop.f32.mrf.mxu1 }
 0xf3f   :  { %v2071_v8 = vadd.f32 %v2070_v7, %v1996_v1  ;;  %v2080_v9 = vadd.f32 %v2076_v4, %v1903_v53 }
 0xf41   :  { %v2084_v13 = vsel %vm98_vm0, %v2080_v9, 0.0  ;;  %v2079_v20 = vadd.f32 %v2071_v8, %v1902_v52 }
 0xf42   :  { %2085 = vadd.xlane.f32.xlu0 %v2084_v13 }
 0xf43   :  { %v2081_v12 = vsel %vm98_vm0, %v2079_v20, 0.0 }
 0xf44   :  { %2082 = vadd.xlane.f32.xlu1 %v2081_v12 }
 0xfcb   :  { %v2086_v14 = vpop.xlane.xlu0 %2085 }
 0xfcc   :  { %v2088_v16 = vmul.f32 0.03125, %v2086_v14 }
 0xfcd   :  { %v2083_v17 = vpop.xlane.xlu1 %2082 }
 0xfce   :  { %v2090_v19 = vsub.f32 %v2080_v9, %v2088_v16  ;;  %v2087_v5 = vmul.f32 0.03125, %v2083_v17 }
 0xfd0   :  { %v2089_v2 = vsub.f32 %v2079_v20, %v2087_v5  ;;  %v2092_v21 = vmul.f32 %v2090_v19, %v2090_v19  ;;  %v2124_v40 = vmul.f32 %v2122_v44, %v2090_v19 }
 0xfd2   :  { %v2096_v23 = vsel %vm98_vm0, %v2092_v21, 0.0  ;;  %v2091_v24 = vmul.f32 %v2089_v2, %v2089_v2  ;;  %v2123_v42 = vmul.f32 %v2122_v44, %v2089_v2 }
 0xfd3   :  { %2097 = vadd.xlane.f32.xlu0 %v2096_v23 }
 0xfd4   :  { %v2093_v25 = vsel %vm98_vm0, %v2091_v24, 0.0 }
 0xfd5   :  { %2094 = vadd.xlane.f32.xlu1 %v2093_v25 }
0x105c   :  { %v2098_v27 = vpop.xlane.xlu0 %2097 }
0x105d   :  { %v2100_v28 = vmul.f32 0.032258064, %v2098_v27 }
0x105e   :  { %v2095_v29 = vpop.xlane.xlu1 %2094 }
0x105f   :  { %2460 = vrsqrt.f32 %v2100_v28  ;;  %v2099_v22 = vmul.f32 0.032258064, %v2095_v29  ;;  %vm2110_vm10 = vcmp.eq.f32.partialorder %v2100_v28, inf  ;;  %v2113_v32 = vand.u32 2147483648, %v2100_v28 }
0x1060   :  { %vm2112_vm11 = vcmp.eq.f32.partialorder %v2100_v28, 0.0 }
0x1061   :  { %2462 = vrsqrt.f32 %v2099_v22  ;;  %vm2103_vm12 = vcmp.eq.f32.partialorder %v2099_v22, inf  ;;  %v2106_v38 = vand.u32 2147483648, %v2099_v22  ;;  %vm2105_vm13 = vcmp.eq.f32.partialorder %v2099_v22, 0.0 }
0x106c   :  { %v2461_v30 = vpop.eup %2460 }
0x106d   :  { %v2109_v31 = vmul.f32 %v2461_v30, %v2100_v28 }
0x106e   :  { %v2463_v33 = vpop.eup %2462 }
0x106f   :  { %v2111_v34 = vsel %vm2110_vm10, %v2100_v28, %v2109_v31  ;;  %v2102_v36 = vmul.f32 %v2463_v33, %v2099_v22 }
0x1070   :  { %v2114_v35 = vsel %vm2112_vm11, %v2113_v32, %v2111_v34 }
0x1071   :  { %v2116_v37 = vadd.f32 1e-06, %v2114_v35  ;;  %v2104_v39 = vsel %vm2103_vm12, %v2099_v22, %v2102_v36 }
0x1072   :  { %v2107_v41 = vsel %vm2105_vm13, %v2106_v38, %v2104_v39 }
0x1073   :  { %2464 = vrcp.f32 %v2116_v37  ;;  %v2115_v6 = vadd.f32 1e-06, %v2107_v41 }
0x1075   :  { %2466 = vrcp.f32 %v2115_v6 }
0x1080   :  { %v2465_v47 = vpop.eup %2464 }
0x1081   :  { %v2126_v48 = vmul.f32 %v2465_v47, %v2124_v40 }
0x1082   :  { %v2467_v49 = vpop.eup %2466 }
0x1083   :  { %v2132_v26 = vadd.f32 %v2130_v46, %v2126_v48  ;;  %v2125_v50 = vmul.f32 %v2467_v49, %v2123_v42 }
0x1085   :  { %2134 = vst.msk [vmem:[#allocation7 + $0x8] sm:$0xff] %vm98_vm0, %v2132_v26  ;;  %v2131_v10 = vadd.f32 %v2130_v46, %v2125_v50 }
0x1087   :  { %2133 = vst.msk [vmem:[#allocation7] sm:$0xff] %vm98_vm0, %v2131_v10 }
0x1088   :  { %2519 = shalt.err (!%p2516_p0)
}
0x1089   :  { %2146 = dma.vmem_to_hbm [thread:$0]  %s2141_s7, 256, %s2896_s9, [#allocation4], %s2535_s12, %s2535_s12, %s2536_s13  }
0x108a   :  { %2532 = dma.done.wait [#allocation4], 256  }
0x108b   :  { %2533 = vsyncadd [#allocation4], 4294967040 }
0x108c   :  { %2150 = vsyncpa [#allocation3], 1 }
0x108d   :  { %2151 = vsyncpa [#allocation6], 1 }
0x108e   :  { %2152 = vsyncpa [#allocation4], 1 }

</bundles_post_ra>
